<compile_context>
chip_gen: v7x
topology: tpu7x:2x2x1
jax: 0.10.0
libtpu: 0.0.40
codegen_flags: <defaults>
</compile_context>

<pallas_src>
import jax
import jax.numpy as jnp
from jax.experimental import pallas as pl
from jax.experimental.pallas import tpu as pltpu


def _round_up(x, m):
    return ((x + m - 1) // m) * m


def _pick_tile(total, preferred, align):
    """Largest multiple of `align` <= preferred that divides `total` (or full dim)."""
    if total <= align or total % align != 0:
        return total
    t = max(align, (min(preferred, total) // align) * align)
    while total % t != 0:
        t -= align
    return t


def ffn_kernel(x_ref, w1_ref, wo_ref, o_ref, acc_ref):
    # x_ref : (tm, H)  activations (original dtype, kept for f32 residual)
    # w1_ref: (H, tn)  up-projection weight tile (bf16), streamed over j
    # wo_ref: (tn, H)  down-projection weight tile (bf16), streamed over j
    # o_ref : (tm, H)  output tile (resident across j)
    # acc_ref: (tm, H) f32 accumulator scratch (resident across j)
    j = pl.program_id(1)

    @pl.when(j == 0)
    def _():
        acc_ref[...] = jnp.zeros_like(acc_ref)

    # Up-projection on the MXU: bf16 operands, f32 accumulation.
    x_bf = x_ref[...].astype(jnp.bfloat16)
    h = jnp.dot(x_bf, w1_ref[...], preferred_element_type=jnp.float32)

    # Exact (erf-based) GELU in f32 to match torch.nn.GELU() default semantics.
    # (Swap to jax.nn.gelu(h, approximate=True) if profiling shows VALU-bound.)
    h = 0.5 * h * (1.0 + jax.lax.erf(h * jnp.float32(0.7071067811865476)))

    # Down-projection on the MXU; accumulate partial sums over intermediate-dim tiles.
    acc_ref[...] += jnp.dot(h.astype(jnp.bfloat16), wo_ref[...],
                            preferred_element_type=jnp.float32)

    @pl.when(j == pl.num_programs(1) - 1)
    def _():
        # Dropout (eval) is identity; residual add in f32, then cast to output dtype.
        o_ref[...] = (acc_ref[...] + x_ref[...].astype(jnp.float32)).astype(o_ref.dtype)


def feed_forward(x, w1, wo, *, tm=256, tn=512, weight_dtype=jnp.bfloat16):
    """x: (B, S, H); w1: (H, 4H); wo: (4H, H) (stored transposed vs torch.nn.Linear)."""
    B, S, H = x.shape
    H_in, H4 = w1.shape
    assert H_in == H and wo.shape == (H4, H)

    M = B * S
    x2d = x.reshape(M, H)

    # Token tile: MXU-aligned for large M, shrunk (multiple of 8) for tiny inputs; pad M.
    tm_eff = _round_up(min(tm, _round_up(M, 8)), 8)
    M_pad = _round_up(M, tm_eff)
    if M_pad != M:
        x2d = jnp.pad(x2d, ((0, M_pad - M), (0, 0)))

    # Intermediate-dim tile (streams the weights, 128-lane aligned).
    tn_eff = _pick_tile(H4, tn, 128)

    # bf16 weights: MXU bf16 peak on v6e/v7x + half the weight HBM traffic / VMEM.
    w1c = w1.astype(weight_dtype)
    woc = wo.astype(weight_dtype)

    gm = M_pad // tm_eff
    gn = H4 // tn_eff

    x_bytes = jnp.dtype(x.dtype).itemsize
    w_bytes = jnp.dtype(weight_dtype).itemsize
    vmem_bytes = (
        2 * tm_eff * H * x_bytes        # x tile, double buffered
        + 2 * H * tn_eff * w_bytes      # w1 tile, double buffered
        + 2 * tn_eff * H * w_bytes      # wo tile, double buffered
        + 2 * tm_eff * H * x_bytes      # output tile, double buffered
        + tm_eff * H * 4                # f32 accumulator scratch
        + 3 * tm_eff * tn_eff * 4       # intermediate h + temporaries (headroom)
    )
    vmem_limit = int(min(96 * 2**20, max(2 * vmem_bytes, 16 * 2**20)))

    cost = pl.CostEstimate(
        flops=4 * M_pad * H * H4,                               # two matmuls (2*M*H*H4 each)
        transcendentals=M_pad * H4,                             # erf per intermediate elem
        bytes_accessed=2 * M_pad * H * x_bytes + 2 * H * H4 * w_bytes * gm,
    )

    out2d = pl.pallas_call(
        ffn_kernel,
        out_shape=jax.ShapeDtypeStruct((M_pad, H), x.dtype),
        grid_spec=pltpu.PrefetchScalarGridSpec(
            num_scalar_prefetch=0,
            grid=(gm, gn),                                      # reduction axis last
            in_specs=[
                pl.BlockSpec((tm_eff, H), lambda i, j: (i, 0)),  # activations
                pl.BlockSpec((H, tn_eff), lambda i, j: (0, j)),  # w1 tile, streamed
                pl.BlockSpec((tn_eff, H), lambda i, j: (j, 0)),  # wo tile, streamed
            ],
            out_specs=pl.BlockSpec((tm_eff, H), lambda i, j: (i, 0)),
            scratch_shapes=[pltpu.VMEM((tm_eff, H), jnp.float32)],
        ),
        compiler_params=pltpu.CompilerParams(
            dimension_semantics=("parallel", "arbitrary"),
            vmem_limit_bytes=vmem_limit,
        ),
        cost_estimate=cost,
    )(x2d, w1c, woc)

    return out2d[:M].reshape(B, S, H)


def feed_forward_ref(x, w1, wo):
    """Pure-JAX f32 reference (eval-mode dropout = identity)."""
    h = jnp.einsum("bsh,hf->bsf", x, w1)
    h = jax.nn.gelu(h, approximate=False)
    y = jnp.einsum("bsf,fh->bsh", h, wo)
    return y + x


if __name__ == "__main__":
    # Small, module-consistent shapes: batch=2, seq=8, hidden=32, up=4 -> intermediate=128.
    B, S, H, UP = 2, 8, 32, 4
    H4 = H * UP

    key = jax.random.PRNGKey(0)
    kx, k1, k2 = jax.random.split(key, 3)

    x = jax.random.normal(kx, (B, S, H), dtype=jnp.float32)

    # Deterministic init mimicking torch.nn.Linear (U(-1/sqrt(fan_in), 1/sqrt(fan_in))),
    # stored transposed so the kernel computes x @ w1 and h @ wo directly.
    b1 = 1.0 / jnp.sqrt(jnp.float32(H))
    b2 = 1.0 / jnp.sqrt(jnp.float32(H4))
    w1 = jax.random.uniform(k1, (H, H4), dtype=jnp.float32, minval=-b1, maxval=b1)
    wo = jax.random.uniform(k2, (H4, H), dtype=jnp.float32, minval=-b2, maxval=b2)

    out = feed_forward(x, w1, wo)
    out = jax.block_until_ready(out)

    ref = feed_forward_ref(x, w1, wo)
    assert out.shape == (B, S, H)
    # bf16 MXU operands -> bf16-appropriate tolerance vs the f32 reference.
    assert jnp.allclose(out, ref, atol=5e-2, rtol=5e-2), "mismatch vs pure-JAX reference"

    print("KERNEL_OK")
</pallas_src>

<mosaic_0001>
module attributes {stable_mosaic.version = 11 : i64} {
  func.func @ffn_kernel(%arg0: i32, %arg1: i32, %arg2: memref<16x32xf32, #tpu.memory_space<vmem>>, %arg3: memref<32x128xbf16, #tpu.memory_space<vmem>>, %arg4: memref<128x32xbf16, #tpu.memory_space<vmem>>, %arg5: memref<16x32xf32, #tpu.memory_space<vmem>>, %arg6: memref<16x32xf32, #tpu.memory_space<vmem>>) attributes {dimension_semantics = [#tpu.dimension_semantics<parallel>, #tpu.dimension_semantics<arbitrary>], iteration_bounds = array<i64: 1, 1>, scalar_prefetch = 0 : i64, scratch_operands = 1 : i64, tpu.core_type = #tpu.core_type<tc>, window_params = [{transform_indices = @transform_0, window_bounds = array<i64: 16, 32>}, {transform_indices = @transform_1, window_bounds = array<i64: 32, 128>}, {transform_indices = @transform_2, window_bounds = array<i64: 128, 32>}, {transform_indices = @transform_3, window_bounds = array<i64: 16, 32>}]} {
    %c0_i32 = arith.constant 0 : i32
    %0 = arith.cmpi eq, %arg1, %c0_i32 : i32
    %1 = arith.extui %0 : i1 to i32
    %c0_i32_0 = arith.constant 0 : i32
    %2 = arith.cmpi ne, %1, %c0_i32_0 : i32
    scf.if %2 {
      %cst_16 = arith.constant 0.000000e+00 : f32
      %24 = vector.broadcast %cst_16 : f32 to vector<16x32xf32>
      %c0_17 = arith.constant 0 : index
      %c0_18 = arith.constant 0 : index
      %25 = vector.load %arg6[%c0_17, %c0_18] : memref<16x32xf32, #tpu.memory_space<vmem>>, vector<16x32xf32>
      tpu.vector_store %arg6[%c0_17, %c0_18], %24 {strides = array<i32>} : memref<16x32xf32, #tpu.memory_space<vmem>>, vector<16x32xf32>,
    } else {
    }
    %c0 = arith.constant 0 : index
    %c0_1 = arith.constant 0 : index
    %3 = vector.load %arg2[%c0, %c0_1] : memref<16x32xf32, #tpu.memory_space<vmem>>, vector<16x32xf32>
    %4 = arith.truncf %3 : vector<16x32xf32> to vector<16x32xbf16>
    %c0_2 = arith.constant 0 : index
    %c0_3 = arith.constant 0 : index
    %5 = vector.load %arg3[%c0_2, %c0_3] : memref<32x128xbf16, #tpu.memory_space<vmem>>, vector<32x128xbf16>
    %cst = arith.constant dense<0.000000e+00> : vector<16x128xf32>
    %6 = tpu.matmul %4, %5, %cst {dimension_numbers = #tpu.dot_dimension_numbers<[1], [0], [0], [1], [0, 0, 1, 1], [], []>} : vector<16x32xbf16>, vector<32x128xbf16>, vector<16x128xf32> -> vector<16x128xf32>
    %cst_4 = arith.constant 5.000000e-01 : f32
    %7 = vector.broadcast %cst_4 : f32 to vector<16x128xf32>
    %8 = arith.mulf %7, %6 : vector<16x128xf32>
    %cst_5 = arith.constant 0.707106769 : f32
    %9 = vector.broadcast %cst_5 : f32 to vector<16x128xf32>
    %10 = arith.mulf %6, %9 : vector<16x128xf32>
    %11 = math.erf %10 : vector<16x128xf32>
    %cst_6 = arith.constant 1.000000e+00 : f32
    %12 = vector.broadcast %cst_6 : f32 to vector<16x128xf32>
    %13 = arith.addf %12, %11 : vector<16x128xf32>
    %14 = arith.mulf %8, %13 : vector<16x128xf32>
    %c0_7 = arith.constant 0 : index
    %c0_8 = arith.constant 0 : index
    %15 = vector.load %arg6[%c0_7, %c0_8] : memref<16x32xf32, #tpu.memory_space<vmem>>, vector<16x32xf32>
    %16 = arith.truncf %14 : vector<16x128xf32> to vector<16x128xbf16>
    %c0_9 = arith.constant 0 : index
    %c0_10 = arith.constant 0 : index
    %17 = vector.load %arg4[%c0_9, %c0_10] : memref<128x32xbf16, #tpu.memory_space<vmem>>, vector<128x32xbf16>
    %cst_11 = arith.constant dense<0.000000e+00> : vector<16x32xf32>
    %18 = tpu.matmul %16, %17, %cst_11 {dimension_numbers = #tpu.dot_dimension_numbers<[1], [0], [0], [1], [0, 0, 1, 1], [], []>} : vector<16x128xbf16>, vector<128x32xbf16>, vector<16x32xf32> -> vector<16x32xf32>
    %19 = arith.addf %15, %18 : vector<16x32xf32>
    %c0_12 = arith.constant 0 : index
    %c0_13 = arith.constant 0 : index
    %20 = vector.load %arg6[%c0_12, %c0_13] : memref<16x32xf32, #tpu.memory_space<vmem>>, vector<16x32xf32>
    tpu.vector_store %arg6[%c0_12, %c0_13], %19 {strides = array<i32>} : memref<16x32xf32, #tpu.memory_space<vmem>>, vector<16x32xf32>,
    %c0_i32_14 = arith.constant 0 : i32
    %21 = arith.cmpi eq, %arg1, %c0_i32_14 : i32
    %22 = arith.extui %21 : i1 to i32
    %c0_i32_15 = arith.constant 0 : i32
    %23 = arith.cmpi ne, %22, %c0_i32_15 : i32
    scf.if %23 {
      %c0_16 = arith.constant 0 : index
      %c0_17 = arith.constant 0 : index
      %24 = vector.load %arg6[%c0_16, %c0_17] : memref<16x32xf32, #tpu.memory_space<vmem>>, vector<16x32xf32>
      %c0_18 = arith.constant 0 : index
      %c0_19 = arith.constant 0 : index
      %25 = vector.load %arg2[%c0_18, %c0_19] : memref<16x32xf32, #tpu.memory_space<vmem>>, vector<16x32xf32>
      %26 = arith.addf %24, %25 : vector<16x32xf32>
      %c0_20 = arith.constant 0 : index
      %c0_21 = arith.constant 0 : index
      %27 = vector.load %arg5[%c0_20, %c0_21] : memref<16x32xf32, #tpu.memory_space<vmem>>, vector<16x32xf32>
      tpu.vector_store %arg5[%c0_20, %c0_21], %26 {strides = array<i32>} : memref<16x32xf32, #tpu.memory_space<vmem>>, vector<16x32xf32>,
    } else {
    }
    return
  }
  func.func @transform_0(%arg0: i32, %arg1: i32) -> (i32, i32) {
    %c0_i32 = arith.constant 0 : i32
    %c0_i32_0 = arith.constant 0 : i32
    return %arg0, %c0_i32 : i32, i32
  }
  func.func @transform_1(%arg0: i32, %arg1: i32) -> (i32, i32) {
    %c0_i32 = arith.constant 0 : i32
    %c0_i32_0 = arith.constant 0 : i32
    return %c0_i32, %arg1 : i32, i32
  }
  func.func @transform_2(%arg0: i32, %arg1: i32) -> (i32, i32) {
    %c0_i32 = arith.constant 0 : i32
    %c0_i32_0 = arith.constant 0 : i32
    return %arg1, %c0_i32 : i32, i32
  }
  func.func @transform_3(%arg0: i32, %arg1: i32) -> (i32, i32) {
    %c0_i32 = arith.constant 0 : i32
    %c0_i32_0 = arith.constant 0 : i32
    return %arg0, %c0_i32 : i32, i32
  }
}

</mosaic_0001>

<bundles_post_ra>
// kernel: tpu_custom_call.1
= control target key start
LH: loop header
LB: loop body
LE: loop exit
PB: predicated region body
PF: predicated region fallthrough
CT: control target
= control target key end

     0   :  { %v330_v1 = vmov 0.0   ;;  %vm331_vm0 = vmmov 0   ;;  %vm20_vm1 = vcmask 261120   ;;  %s418_s0 = inlined_call_operand.vmem [shape: f32[16,32], index: 0, kind: input, shape index: {}]   ;;  %s419_s1 = inlined_call_operand.vmem [shape: bf16[32,128], index: 1, kind: input, shape index: {}]   ;;  %s420_s2 = inlined_call_operand.vmem [shape: bf16[128,32], index: 2, kind: input, shape index: {}]   ;;  %s421_s3 = inlined_call_operand.hbm [shape: f32[16,32], index: 3, kind: output, shape index: {}]  }
   0x1   :  { %v292_v0 = vld [vmem:[%s419_s1] sm:$0xff]   ;;  %259 = vmatprep.subr.bf16.mxu0 %v330_v1  ;;  %v293_v2 = vld [vmem:[%s419_s1 + $0x8] sm:$0xff]   ;;  %267 = vmatprep.subr.bf16.mxu1 %v330_v1  ;;  %21 = vst.msk [vmem:[#allocation2] sm:$0xff] %vm20_vm1, %v330_v1  ;;  %22 = vst.msk [vmem:[#allocation2 + $0x8] sm:$0xff] %vm20_vm1, %v330_v1 }
   0x2   :  { %260 = vmatpush3.bf16.msra.mxu0 %v292_v0  ;;  %263 = vmatprep.mubr.msk.bf16.mxu0 %vm331_vm0, %v330_v1  ;;  %v364_v3 = vld [vmem:[%s418_s0] sm:$0xff]  ;;  %v369_v4 = vld [vmem:[%s418_s0 + $0x8] sm:$0xff]  ;;  %v296_v8 = vld [vmem:[%s420_s2 + $0x10] sm:$0xff]  }
   0x3   :  { %261 = vmatprep.subr.bf16.mxu0 %v330_v1  ;;  %v294_v5 = vld [vmem:[%s420_s2] sm:$0xff]   ;;  %283 = vmatprep.mubr.msk.bf16.mxu1 %vm331_vm0, %v330_v1  ;;  %v25_v6 = vpack.c.bf16 %v369_v4, %v364_v3  ;;  %v295_v7 = vld [vmem:[%s420_s2 + $0x8] sm:$0xff]  }
   0x4   :  { %268 = vmatpush3.bf16.msra.mxu1 %v294_v5 }
   0x5   :  { %269 = vmatprep.subr.bf16.mxu1 %v330_v1 }
   0x6   :  { %262 = vmatpush3.bf16.msra.mxu0 %v293_v2 }
   0x8   :  { %270 = vmatpush3.bf16.msra.mxu1 %v295_v7 }
   0x9   :  { %264 = vmatmul.mubr.msk.bf16.vlgmr.msra.gmra.mrb[0].mxu0 %vm20_vm1, %v25_v6 }
   0xa   :  { %8 = vsyncpa [#allocation4], 0  ;;  %271 = vmatprep.subr.bf16.mxu1 %v330_v1  ;;  %v297_v9 = vld [vmem:[%s420_s2 + $0x18] sm:$0xff]   ;;  %v298_v10 = vld [vmem:[%s420_s2 + $0x20] sm:$0xff]  }
   0xb   :  { %v299_v11 = vld [vmem:[%s420_s2 + $0x28] sm:$0xff]   ;;  %v300_v12 = vld [vmem:[%s420_s2 + $0x30] sm:$0xff]   ;;  %v301_v13 = vld [vmem:[%s420_s2 + $0x38] sm:$0xff]   ;;  %s332_s2 = smov [#allocation3]  }
   0xc   :  { %272 = vmatpush3.bf16.msra.mxu1 %v296_v8  ;;  %v97_v29 = vld [vmem:[#allocation2] sm:$0xff]  ;;  %v98_v31 = vld [vmem:[#allocation2 + $0x8] sm:$0xff]  ;;  %s225_s7 = sshll.u32 %s332_s2, 4  ;;  %s226_s7 = int_to_ptr.vmem [resolvable:$true] %s225_s7 }
   0xd   :  { %273 = vmatprep.subr.bf16.mxu1 %v330_v1  ;;  %s306_s8 = scalar_lea.vmem %s226_s7, 256  ;;  %p311_p1 = scmp.lt.s32.totalorder %s226_s7, %s226_s7 }
   0xe   :  { %p307_p0 = scmp.ne.s32.totalorder %s226_s7, %s306_s8  ;;  %p312_p2 = scmp.lt.s32.totalorder %s306_s8, %s306_s8 }
  0x10   :  { %274 = vmatpush3.bf16.msra.mxu1 %v297_v9  ;;  %p313_p3 = por %p312_p2, %p311_p1 }
  0x11   :  { %275 = vmatprep.subr.bf16.mxu1 %v330_v1 }
  0x12   :  { %p314_p4 = pnand %p313_p3, %p307_p0 }
  0x14   :  { %276 = vmatpush3.bf16.msra.mxu1 %v298_v10 }
  0x15   :  { %277 = vmatprep.subr.bf16.mxu1 %v330_v1 }
  0x18   :  { %278 = vmatpush3.bf16.msra.mxu1 %v299_v11 }
  0x19   :  { %279 = vmatprep.subr.bf16.mxu1 %v330_v1 }
  0x1c   :  { %280 = vmatpush3.bf16.msra.mxu1 %v300_v12 }
  0x1d   :  { %281 = vmatprep.subr.bf16.mxu1 %v330_v1 }
  0x20   :  { %282 = vmatpush3.bf16.msra.mxu1 %v301_v13 }
  0xdc   :  { %v80_v14 = vpop.f32.mrb[0].mxu0 }
  0xdd   :  { %v89_v15 = vmul.f32 0.70710677, %v80_v14  ;;  %v265_v16 = vpop.f32.mrb[1].mxu0  ;;  %v87_v23 = vmul.f32 0.5, %v80_v14 }
  0xde   :  { %v83_v17 = vpop.f32.mrb[2].mxu0 }
  0xdf   :  { %302 = verf.f32 %v89_v15  ;;  %v90_v18 = vmul.f32 0.70710677, %v83_v17  ;;  %v266_v19 = vpop.f32.mrb[3].mxu0  ;;  %v88_v24 = vmul.f32 0.5, %v83_v17 }
  0xe1   :  { %304 = verf.f32 %v90_v18 }
  0xe9   :  { %v303_v20 = vpop.eup %302 }
  0xea   :  { %v93_v21 = vadd.f32 1.0, %v303_v20 }
  0xeb   :  { %v305_v22 = vpop.eup %304 }
  0xec   :  { %v94_v25 = vadd.f32 1.0, %v305_v22  ;;  %v95_v26 = vmul.f32 %v93_v21, %v87_v23 }
  0xee   :  { %v96_v27 = vmul.f32 %v94_v25, %v88_v24 }
  0xf0   :  { %v99_v28 = vpack.c.bf16 %v96_v27, %v95_v26 }
  0xf2   :  { %284 = vmatmul.mubr.bf16.vlgmr.msra.gmra.mrb[0].mxu1 %v99_v28 }
 0x1c5   :  { %v198_v30 = vpop.f32.mrb[0].mxu1 }
 0x1c6   :  { %v205_v32 = vadd.f32 %v198_v30, %v97_v29  ;;  %v285_v33 = vpop.f32.mrb[1].mxu1 }
 0x1c7   :  { %v201_v34 = vpop.f32.mrb[2].mxu1 }
 0x1c8   :  { %207 = vst.msk [vmem:[#allocation2] sm:$0xff] %vm20_vm1, %v205_v32  ;;  %v206_v35 = vadd.f32 %v201_v34, %v98_v31  ;;  %v286_v36 = vpop.f32.mrb[3].mxu1 }
 0x1ca   :  { %208 = vst.msk [vmem:[#allocation2 + $0x8] sm:$0xff] %vm20_vm1, %v206_v35 }
 0x1cf   :  { %v212_v37 = vld [vmem:[#allocation2] sm:$0xff] }
 0x1d0   :  { %v216_v38 = vadd.f32 %v212_v37, %v364_v3 }
 0x1d1   :  { %v213_v39 = vld [vmem:[#allocation2 + $0x8] sm:$0xff] }
 0x1d2   :  { %v217_v40 = vadd.f32 %v213_v39, %v369_v4  ;;  %218 = vst.msk [vmem:[#allocation3] sm:$0xff] %vm20_vm1, %v216_v38 }
 0x1d4   :  { %219 = vst.msk [vmem:[#allocation3 + $0x8] sm:$0xff] %vm20_vm1, %v217_v40 }
 0x1d5   :  { %317 = shalt.err (!%p314_p4)
}
 0x1d6   :  { %s318_s11 = scalar_lea.hbm %s421_s3, 256 }
 0x1d7   :  { %p319_p5 = scmp.ne.s32.totalorder %s421_s3, %s318_s11  ;;  %p322_p6 = scmp.lt.u32.totalorder %s318_s11, %s421_s3 }
 0x1d9   :  { %p324_p7 = pnand %p322_p6, %p319_p5 }
 0x1db   :  { %327 = shalt.err (!%p324_p7)
}
 0x1dc   :  { %s333_s16 = smov 128   ;;  %s334_s17 = smov 8  }
 0x1dd   :  { %231 = dma.vmem_to_hbm [thread:$0]  %s226_s7, 256, %s421_s3, [#allocation4], %s333_s16, %s333_s16, %s334_s17  }
 0x1de   :  { %328 = dma.done.wait [#allocation4], 256  }
 0x1df   :  { %329 = vsyncadd [#allocation4], 4294967040 }
 0x1e0   :  { %235 = vsyncpa [#allocation4], 1 }

</bundles_post_ra>
